<compile_context>
chip_gen: v7x
topology: tpu7x:2x2x1
jax: 0.10.0
libtpu: 0.0.40
codegen_flags: <defaults>
</compile_context>

<pallas_src>
import jax
import jax.numpy as jnp
from jax.experimental import pallas as pl
from jax.experimental.pallas import tpu as pltpu


def _critic_kernel(x_ref, a_ref, w1x_ref, w1a_ref, w2_ref, vp_ref, o_ref):
    # fc1: torch.cat([x, a], 1) done implicitly by summing two bf16 MXU dots
    # into one f32 accumulator.
    h1 = jnp.dot(x_ref[...].astype(jnp.bfloat16), w1x_ref[...],
                 preferred_element_type=jnp.float32)
    h1 = h1 + jnp.dot(a_ref[...].astype(jnp.bfloat16), w1a_ref[...],
                      preferred_element_type=jnp.float32)
    b1 = vp_ref[0:1, :]                              # (1, H) f32
    h1 = jnp.maximum(h1 + b1, 0.0)                   # bias + ReLU in f32 (VPU)

    # fc2: bf16 MXU dot, f32 accumulate, f32 epilogue.
    h2 = jnp.dot(h1.astype(jnp.bfloat16), w2_ref[...],
                 preferred_element_type=jnp.float32)
    b2 = vp_ref[1:2, :]
    h2 = jnp.maximum(h2 + b2, 0.0)

    # fc3 (out_features == 1): VPU multiply + lane reduction instead of an
    # N=1 MXU matmul (which would waste almost all output lanes).
    w3 = vp_ref[2:3, :]                              # (1, H) f32
    b3 = vp_ref[3:4, 0:1]                            # (1, 1) f32
    q = jnp.sum(h2 * w3, axis=-1, keepdims=True) + b3
    o_ref[...] = q.astype(o_ref.dtype)


def critic_forward(x, a, params, *, tile_b=128):
    """x: (B, obs_dim_total) f32, a: (B, act_dim_total) f32 -> (B, 1) Q."""
    w1x, w1a, w2, vec = params
    B, obs_dim = x.shape
    act_dim = a.shape[1]
    H = w2.shape[1]

    if B % tile_b != 0:          # fall back to a single block for ragged B
        tile_b = B
    grid = (B // tile_b,)

    return pl.pallas_call(
        _critic_kernel,
        out_shape=jax.ShapeDtypeStruct((B, 1), jnp.float32),
        grid_spec=pltpu.PrefetchScalarGridSpec(
            num_scalar_prefetch=0,
            grid=grid,
            in_specs=[
                # activations: blocked along the batch axis
                pl.BlockSpec((tile_b, obs_dim), lambda i: (i, 0)),
                pl.BlockSpec((tile_b, act_dim), lambda i: (i, 0)),
                # weights: constant index_map -> DMA'd once, VMEM-resident
                pl.BlockSpec((obs_dim, H), lambda i: (0, 0)),
                pl.BlockSpec((act_dim, H), lambda i: (0, 0)),
                pl.BlockSpec((H, H), lambda i: (0, 0)),
                pl.BlockSpec((4, H), lambda i: (0, 0)),
            ],
            out_specs=pl.BlockSpec((tile_b, 1), lambda i: (i, 0)),
        ),
        compiler_params=pltpu.CompilerParams(
            dimension_semantics=("parallel",)),
    )(x, a, w1x, w1a, w2, vec)


def init_critic_params(key, obs_dim, act_dim, hidden):
    """nn.Linear-style U(-1/sqrt(fan_in), 1/sqrt(fan_in)) init.

    All layout transformations are done ONCE here:
      * W1 (in_dim, H) is split row-wise into (obs_dim, H) and (act_dim, H).
      * W1/W2 are stored in bf16 (MXU-native); f32 master copy not needed for
        a forward-only kernel.
      * b1, b2, W3-as-a-row and the b3 scalar are packed into one (4, H) f32
        array (rows: b1 | b2 | w3 | [b3, 0, ...]) to minimize DMA descriptors.
    """
    in_dim = obs_dim + act_dim
    ks = jax.random.split(key, 6)

    def linear(kw, kb, fan_in, fan_out):
        bound = 1.0 / float(fan_in) ** 0.5
        w = jax.random.uniform(kw, (fan_in, fan_out), jnp.float32, -bound, bound)
        b = jax.random.uniform(kb, (fan_out,), jnp.float32, -bound, bound)
        return w, b

    w1, b1 = linear(ks[0], ks[1], in_dim, hidden)
    w2, b2 = linear(ks[2], ks[3], hidden, hidden)
    w3, b3 = linear(ks[4], ks[5], hidden, 1)

    w1x = w1[:obs_dim].astype(jnp.bfloat16)
    w1a = w1[obs_dim:].astype(jnp.bfloat16)
    w2_bf = w2.astype(jnp.bfloat16)

    b3_row = jnp.zeros((hidden,), jnp.float32).at[0].set(b3[0])
    vec = jnp.stack([b1, b2, w3[:, 0], b3_row], axis=0)   # (4, hidden) f32
    return (w1x, w1a, w2_bf, vec)


def critic_reference(x, a, params):
    """Pure-JAX reference matching the kernel's numerics (bf16 weights,
    bf16-cast activations, f32 accumulation, f32 epilogue)."""
    w1x, w1a, w2, vec = params
    b1, b2, w3, b3 = vec[0], vec[1], vec[2], vec[3, 0]
    xb = x.astype(jnp.bfloat16).astype(jnp.float32)
    ab = a.astype(jnp.bfloat16).astype(jnp.float32)
    h = (jnp.dot(xb, w1x.astype(jnp.float32), precision="highest")
         + jnp.dot(ab, w1a.astype(jnp.float32), precision="highest") + b1)
    h = jnp.maximum(h, 0.0)
    hb = h.astype(jnp.bfloat16).astype(jnp.float32)
    h2 = jnp.maximum(
        jnp.dot(hb, w2.astype(jnp.float32), precision="highest") + b2, 0.0)
    return jnp.sum(h2 * w3, axis=-1, keepdims=True) + b3


if __name__ == "__main__":
    # Small-shape stand-ins for the Args-derived dims:
    #   num_drones = 2, per-drone observation dim = 16, per-drone action dim = 3
    #   critic_model_size shrunk from 512 -> 128; batch = 256 with TILE_B = 128
    #   so the batch-tiled grid actually has >1 step (and megacore sharding on
    #   v7x has work to split).
    B = 256
    TILE_B = 128
    num_drones = 2
    obs_dim_per_drone = 16
    act_dim_per_drone = 3
    hidden = 128

    obs_total = obs_dim_per_drone * num_drones   # 32
    act_total = act_dim_per_drone * num_drones   # 6

    key = jax.random.PRNGKey(0)
    kx, ka, kp = jax.random.split(key, 3)
    x = jax.random.normal(kx, (B, obs_total), jnp.float32)
    a = jax.random.uniform(ka, (B, act_total), jnp.float32, -1.0, 1.0)

    params = init_critic_params(kp, obs_total, act_total, hidden)

    critic_fn = jax.jit(lambda xx, aa, pp: critic_forward(xx, aa, pp, tile_b=TILE_B))
    q = jax.block_until_ready(critic_fn(x, a, params))

    q_ref = critic_reference(x, a, params)
    assert q.shape == (B, 1), q.shape
    max_err = float(jnp.max(jnp.abs(q - q_ref)))
    assert jnp.allclose(q, q_ref, atol=5e-3, rtol=5e-3), max_err

    print("KERNEL_OK")
</pallas_src>

<mosaic_0001>
module attributes {stable_mosaic.version = 11 : i64} {
  func.func @_critic_kernel(%arg0: i32, %arg1: memref<128x32xf32, #tpu.memory_space<vmem>>, %arg2: memref<128x6xf32, #tpu.memory_space<vmem>>, %arg3: memref<32x128xbf16, #tpu.memory_space<vmem>>, %arg4: memref<6x128xbf16, #tpu.memory_space<vmem>>, %arg5: memref<128x128xbf16, #tpu.memory_space<vmem>>, %arg6: memref<4x128xf32, #tpu.memory_space<vmem>>, %arg7: memref<128x1xf32, #tpu.memory_space<vmem>>) attributes {dimension_semantics = [#tpu.dimension_semantics<parallel>], iteration_bounds = array<i64: 2>, scalar_prefetch = 0 : i64, scratch_operands = 0 : i64, tpu.core_type = #tpu.core_type<tc>, window_params = [{transform_indices = @transform_0, window_bounds = array<i64: 128, 32>}, {transform_indices = @transform_1, window_bounds = array<i64: 128, 6>}, {pipeline_mode = #tpu.pipeline_mode<synchronous>, transform_indices = @transform_2, window_bounds = array<i64: 32, 128>}, {pipeline_mode = #tpu.pipeline_mode<synchronous>, transform_indices = @transform_3, window_bounds = array<i64: 6, 128>}, {pipeline_mode = #tpu.pipeline_mode<synchronous>, transform_indices = @transform_4, window_bounds = array<i64: 128, 128>}, {pipeline_mode = #tpu.pipeline_mode<synchronous>, transform_indices = @transform_5, window_bounds = array<i64: 4, 128>}, {transform_indices = @transform_6, window_bounds = array<i64: 128, 1>}]} {
    %c0 = arith.constant 0 : index
    %c0_0 = arith.constant 0 : index
    %0 = vector.load %arg1[%c0, %c0_0] : memref<128x32xf32, #tpu.memory_space<vmem>>, vector<128x32xf32>
    %1 = arith.truncf %0 : vector<128x32xf32> to vector<128x32xbf16>
    %c0_1 = arith.constant 0 : index
    %c0_2 = arith.constant 0 : index
    %2 = vector.load %arg3[%c0_1, %c0_2] : memref<32x128xbf16, #tpu.memory_space<vmem>>, vector<32x128xbf16>
    %cst = arith.constant dense<0.000000e+00> : vector<128x128xf32>
    %3 = tpu.matmul %1, %2, %cst {dimension_numbers = #tpu.dot_dimension_numbers<[1], [0], [0], [1], [0, 0, 1, 1], [], []>} : vector<128x32xbf16>, vector<32x128xbf16>, vector<128x128xf32> -> vector<128x128xf32>
    %c0_3 = arith.constant 0 : index
    %c0_4 = arith.constant 0 : index
    %4 = vector.load %arg2[%c0_3, %c0_4] : memref<128x6xf32, #tpu.memory_space<vmem>>, vector<128x6xf32>
    %5 = arith.truncf %4 : vector<128x6xf32> to vector<128x6xbf16>
    %c0_5 = arith.constant 0 : index
    %c0_6 = arith.constant 0 : index
    %6 = vector.load %arg4[%c0_5, %c0_6] : memref<6x128xbf16, #tpu.memory_space<vmem>>, vector<6x128xbf16>
    %cst_7 = arith.constant dense<0.000000e+00> : vector<128x128xf32>
    %7 = tpu.matmul %5, %6, %cst_7 {dimension_numbers = #tpu.dot_dimension_numbers<[1], [0], [0], [1], [0, 0, 1, 1], [], []>} : vector<128x6xbf16>, vector<6x128xbf16>, vector<128x128xf32> -> vector<128x128xf32>
    %8 = arith.addf %3, %7 : vector<128x128xf32>
    %c0_8 = arith.constant 0 : index
    %c0_9 = arith.constant 0 : index
    %9 = vector.load %arg6[%c0_8, %c0_9] : memref<4x128xf32, #tpu.memory_space<vmem>>, vector<1x128xf32>
    %10 = vector.broadcast %9 : vector<1x128xf32> to vector<128x128xf32>
    %11 = arith.addf %8, %10 : vector<128x128xf32>
    %cst_10 = arith.constant 0.000000e+00 : f32
    %12 = vector.broadcast %cst_10 : f32 to vector<128x128xf32>
    %13 = arith.maximumf %11, %12 : vector<128x128xf32>
    %14 = arith.truncf %13 : vector<128x128xf32> to vector<128x128xbf16>
    %c0_11 = arith.constant 0 : index
    %c0_12 = arith.constant 0 : index
    %15 = vector.load %arg5[%c0_11, %c0_12] : memref<128x128xbf16, #tpu.memory_space<vmem>>, vector<128x128xbf16>
    %cst_13 = arith.constant dense<0.000000e+00> : vector<128x128xf32>
    %16 = tpu.matmul %14, %15, %cst_13 {dimension_numbers = #tpu.dot_dimension_numbers<[1], [0], [0], [1], [0, 0, 1, 1], [], []>} : vector<128x128xbf16>, vector<128x128xbf16>, vector<128x128xf32> -> vector<128x128xf32>
    %c1 = arith.constant 1 : index
    %c0_14 = arith.constant 0 : index
    %17 = vector.load %arg6[%c1, %c0_14] : memref<4x128xf32, #tpu.memory_space<vmem>>, vector<1x128xf32>
    %18 = vector.broadcast %17 : vector<1x128xf32> to vector<128x128xf32>
    %19 = arith.addf %16, %18 : vector<128x128xf32>
    %cst_15 = arith.constant 0.000000e+00 : f32
    %20 = vector.broadcast %cst_15 : f32 to vector<128x128xf32>
    %21 = arith.maximumf %19, %20 : vector<128x128xf32>
    %c2 = arith.constant 2 : index
    %c0_16 = arith.constant 0 : index
    %22 = vector.load %arg6[%c2, %c0_16] : memref<4x128xf32, #tpu.memory_space<vmem>>, vector<1x128xf32>
    %c3 = arith.constant 3 : index
    %c0_17 = arith.constant 0 : index
    %23 = vector.load %arg6[%c3, %c0_17] : memref<4x128xf32, #tpu.memory_space<vmem>>, vector<1x1xf32>
    %24 = vector.broadcast %22 : vector<1x128xf32> to vector<128x128xf32>
    %25 = arith.mulf %21, %24 : vector<128x128xf32>
    %cst_18 = arith.constant dense<0.000000e+00> : vector<128xf32>
    %26 = vector.multi_reduction <add>, %25, %cst_18 [1] : vector<128x128xf32> to vector<128xf32>
    %27 = vector.shape_cast %26 : vector<128xf32> to vector<128x1xf32>
    %28 = vector.broadcast %23 : vector<1x1xf32> to vector<128x1xf32>
    %29 = arith.addf %27, %28 : vector<128x1xf32>
    %c0_19 = arith.constant 0 : index
    %c0_20 = arith.constant 0 : index
    %30 = vector.load %arg7[%c0_19, %c0_20] : memref<128x1xf32, #tpu.memory_space<vmem>>, vector<128x1xf32>
    tpu.vector_store %arg7[%c0_19, %c0_20], %29 {strides = array<i32>} : memref<128x1xf32, #tpu.memory_space<vmem>>, vector<128x1xf32>,
    return
  }
  func.func @transform_0(%arg0: i32) -> (i32, i32) {
    %c0_i32 = arith.constant 0 : i32
    %c0_i32_0 = arith.constant 0 : i32
    return %arg0, %c0_i32 : i32, i32
  }
  func.func @transform_1(%arg0: i32) -> (i32, i32) {
    %c0_i32 = arith.constant 0 : i32
    %c0_i32_0 = arith.constant 0 : i32
    return %arg0, %c0_i32 : i32, i32
  }
  func.func @transform_2(%arg0: i32) -> (i32, i32) {
    %c0_i32 = arith.constant 0 : i32
    %c0_i32_0 = arith.constant 0 : i32
    %c0_i32_1 = arith.constant 0 : i32
    return %c0_i32, %c0_i32_0 : i32, i32
  }
  func.func @transform_3(%arg0: i32) -> (i32, i32) {
    %c0_i32 = arith.constant 0 : i32
    %c0_i32_0 = arith.constant 0 : i32
    %c0_i32_1 = arith.constant 0 : i32
    return %c0_i32, %c0_i32_0 : i32, i32
  }
  func.func @transform_4(%arg0: i32) -> (i32, i32) {
    %c0_i32 = arith.constant 0 : i32
    %c0_i32_0 = arith.constant 0 : i32
    %c0_i32_1 = arith.constant 0 : i32
    return %c0_i32, %c0_i32_0 : i32, i32
  }
  func.func @transform_5(%arg0: i32) -> (i32, i32) {
    %c0_i32 = arith.constant 0 : i32
    %c0_i32_0 = arith.constant 0 : i32
    %c0_i32_1 = arith.constant 0 : i32
    return %c0_i32, %c0_i32_0 : i32, i32
  }
  func.func @transform_6(%arg0: i32) -> (i32, i32) {
    %c0_i32 = arith.constant 0 : i32
    %c0_i32_0 = arith.constant 0 : i32
    return %arg0, %c0_i32 : i32, i32
  }
}

</mosaic_0001>

<bundles_post_ra>
// kernel: _lambda_.1
= control target key start
LH: loop header
LB: loop body
LE: loop exit
PB: predicated region body
PF: predicated region fallthrough
CT: control target
= control target key end

     0   :  { %s1203_s21 = smov 0   ;;  %s1395_s0 = inlined_call_operand.vmem [shape: f32[256,32], index: 0, kind: input, shape index: {}]   ;;  %s1396_s1 = inlined_call_operand.vmem [shape: f32[256,6], index: 1, kind: input, shape index: {}]   ;;  %s1397_s2 = inlined_call_operand.vmem [shape: bf16[32,128], index: 2, kind: input, shape index: {}]   ;;  %s1398_s3 = inlined_call_operand.vmem [shape: bf16[6,128], index: 3, kind: input, shape index: {}]   ;;  %s1399_s4 = inlined_call_operand.vmem [shape: bf16[128,128], index: 4, kind: input, shape index: {}]   ;;  %s1400_s5 = inlined_call_operand.vmem [shape: f32[4,128], index: 5, kind: input, shape index: {}]   ;;  %s1401_s6 = inlined_call_operand.vmem [shape: f32[256,1], index: 6, kind: output, shape index: {}]  }
   0x1 LB: > { %s977_s22 = sadd.s32 4294967295, %s1166_s21   ;;  %p981_p0 = scmp.ge.s32.totalorder %s1166_s21, 1  ;;  %s1166_s21 = sphi %s1203_s21, %s16_s21  }
   0x2   : > { %p224_p1 = scmp.lt.s32.totalorder %s1166_s21, 3 }
   0x4   : > { %p225_p2 = pnand %p981_p0, %p224_p1 }
   0x5   : > { %v330_v0 = vld [vmem:[%s1398_s3] sm:$0x7] (!%p225_p2)  ;;  %vm356_vm0 = vcmask (!%p225_p2), 1042432   ;;  %s982_s25 = sshll.u32 (!%p225_p2), %s977_s22, 4  ;;  %v1153_v4 = vld [vmem:[%s1399_s4 + $0x8] sm:$0xff] (!%p225_p2)   ;;  %v1154_v5 = vld [vmem:[%s1399_s4 + $0x10] sm:$0xff] (!%p225_p2)  }
   0x6   : > { %228 = sbr.rel (%p225_p2) target bundleno = 668 (0x29c), region = 44  ;;  %v1150_v1 = vld [vmem:[%s1397_s2] sm:$0xff] (!%p225_p2)   ;;  %1141 = vmatprep.subr.msk.bf16.mxu0 (!%p225_p2), %vm356_vm0, %v330_v0  ;;  %v358_v2 = vsel (!%p225_p2), %vm356_vm0, %v330_v0, 0  ;;  %p260_p3 = scmp.lt.s32.totalorder (!%p225_p2), %s982_s25, 31  ;;  %vm331_vm1 = vcmask (!%p225_p2), 48128   ;;  %v1151_v15 = vld [vmem:[%s1397_s2 + $0x8] sm:$0xff] (!%p225_p2)  }
   0x7   : > { %1056 = vmatpush3.bf16.msra.mxu0 (!%p225_p2), %v358_v2  ;;  %v1152_v3 = vld [vmem:[%s1399_s4] sm:$0xff] (!%p225_p2)   ;;  %v1155_v16 = vld [vmem:[%s1399_s4 + $0x18] sm:$0xff] (!%p225_p2)   ;;  %v1157_v26 = vld [vmem:[%s1399_s4 + $0x28] sm:$0xff] (!%p225_p2)   ;;  %vm469_vm2 = vcmask (!%p225_p2), 261120   ;;  %vm892_vm3 = vcmask (!%p225_p2), 7168  }
   0x8   : > { %1073 = vmatprep.subr.bf16.mxu0 (!%p225_p2), %v1150_v1  ;;  %1093 = vmatprep.subr.bf16.mxu1 (!%p225_p2), %v1152_v3  ;;  %v1156_v25 = vld [vmem:[%s1399_s4 + $0x20] sm:$0xff] (!%p225_p2)   ;;  %v1158_v58 = vld [vmem:[%s1399_s4 + $0x30] sm:$0xff] (!%p225_p2)   ;;  %v1159_v59 = vld [vmem:[%s1399_s4 + $0x38] sm:$0xff] (!%p225_p2)  }
   0x9   : > { %1094 = vmatpush3.bf16.msra.mxu1 (!%p225_p2), %v1152_v3  ;;  %v1006_v60 = vld [vmem:[%s1400_s5] ss:$0 sm:$0xff] (!%p225_p2) }
   0xa   : > { %1095 = vmatprep.subr.bf16.mxu1 (!%p225_p2), %v1153_v4 }
   0xd   : > { %s1403_s25 = smov (!%p260_p3, %s982_s25), 31  ;;  %1096 = vmatpush3.bf16.msra.mxu1 %v1153_v4 }
   0xe   : > { %s1223_s8 = sshll.u32 %s1403_s25, 3  ;;  %1097 = vmatprep.subr.bf16.mxu1 %v1154_v5 }
   0xf   : > { %s1229_s11 = scalar_lea.vmem %s1396_s1, %s1223_s8  ;;  %s1269_s25 = scalar_lea.vmem %s1395_s0, %s1223_s8 }
  0x10   : > { %v306_v6 = vld [vmem:[%s1229_s11] sm:$0xff]  ;;  %v307_v7 = vld [vmem:[%s1229_s11 + $0x8] sm:$0xff]  ;;  %v308_v8 = vld [vmem:[%s1229_s11 + $0x10] sm:$0xff]  ;;  %s1358_s17 = scalar_lea.vmem %s1401_s6, %s1223_s8 }
  0x11   : > { %v322_v9 = vpack.c.bf16 %v307_v7, %v306_v6  ;;  %v309_v10 = vld [vmem:[%s1229_s11 + $0x18] sm:$0xff]  ;;  %v310_v11 = vld [vmem:[%s1229_s11 + $0x20] sm:$0xff]  ;;  %v311_v12 = vld [vmem:[%s1229_s11 + $0x28] sm:$0xff]  ;;  %1098 = vmatpush3.bf16.msra.mxu1 %v1154_v5 }
  0x12   : > { %v323_v13 = vpack.c.bf16 %v309_v10, %v308_v8  ;;  %v324_v14 = vpack.c.bf16 %v311_v12, %v310_v11  ;;  %v312_v17 = vld [vmem:[%s1229_s11 + $0x30] sm:$0xff]  ;;  %v313_v18 = vld [vmem:[%s1229_s11 + $0x38] sm:$0xff]  ;;  %v314_v19 = vld [vmem:[%s1229_s11 + $0x40] sm:$0xff]  ;;  %1099 = vmatprep.subr.bf16.mxu1 %v1155_v16 }
  0x13   : > { %1057 = vmatprep.mubr.msk.bf16.mxu0 %vm331_vm1, %v322_v9  ;;  %v315_v20 = vld [vmem:[%s1229_s11 + $0x48] sm:$0xff]  ;;  %v325_v21 = vpack.c.bf16 %v313_v18, %v312_v17  ;;  %v316_v23 = vld [vmem:[%s1229_s11 + $0x50] sm:$0xff]  ;;  %v317_v24 = vld [vmem:[%s1229_s11 + $0x58] sm:$0xff] }
  0x14   : > { %1058 = vmatmul.mubr.msk.bf16.vlgmr.msra.gmra.mrb[0].mxu0 %vm331_vm1, %v323_v13  ;;  %v326_v22 = vpack.c.bf16 %v315_v20, %v314_v19  ;;  %v318_v27 = vld [vmem:[%s1229_s11 + $0x60] sm:$0xff]  ;;  %v319_v28 = vld [vmem:[%s1229_s11 + $0x68] sm:$0xff]  ;;  %v327_v29 = vpack.c.bf16 %v317_v24, %v316_v23  ;;  %v320_v31 = vld [vmem:[%s1229_s11 + $0x70] sm:$0xff] }
  0x15   : > { %1074 = vmatpush3.bf16.msra.mxu0 %v1150_v1  ;;  %1061 = vmatprep.mubr.msk.bf16.mxu0 %vm331_vm1, %v324_v14  ;;  %v328_v30 = vpack.c.bf16 %v319_v28, %v318_v27  ;;  %v321_v32 = vld [vmem:[%s1229_s11 + $0x78] sm:$0xff]  ;;  %v278_v33 = vld [vmem:[%s1269_s25] sm:$0xff]  ;;  %v279_v34 = vld [vmem:[%s1269_s25 + $0x8] sm:$0xff] }
  0x16   : > { %1075 = vmatprep.subr.bf16.mxu0 %v1151_v15  ;;  %1100 = vmatpush3.bf16.msra.mxu1 %v1155_v16  ;;  %v329_v35 = vpack.c.bf16 %v321_v32, %v320_v31  ;;  %v294_v36 = vpack.c.bf16 %v279_v34, %v278_v33  ;;  %v280_v37 = vld [vmem:[%s1269_s25 + $0x10] sm:$0xff]  ;;  %v281_v38 = vld [vmem:[%s1269_s25 + $0x18] sm:$0xff]  ;;  %v282_v39 = vld [vmem:[%s1269_s25 + $0x20] sm:$0xff] }
  0x17   : > { %1101 = vmatprep.subr.bf16.mxu1 %v1156_v25  ;;  %v283_v40 = vld [vmem:[%s1269_s25 + $0x28] sm:$0xff]  ;;  %v295_v41 = vpack.c.bf16 %v281_v38, %v280_v37  ;;  %v284_v43 = vld [vmem:[%s1269_s25 + $0x30] sm:$0xff]  ;;  %v285_v44 = vld [vmem:[%s1269_s25 + $0x38] sm:$0xff] }
  0x18   : > { %v296_v42 = vpack.c.bf16 %v283_v40, %v282_v39  ;;  %v286_v45 = vld [vmem:[%s1269_s25 + $0x40] sm:$0xff]  ;;  %v287_v46 = vld [vmem:[%s1269_s25 + $0x48] sm:$0xff]  ;;  %v297_v47 = vpack.c.bf16 %v285_v44, %v284_v43  ;;  %v288_v49 = vld [vmem:[%s1269_s25 + $0x50] sm:$0xff] }
  0x19   : > { %1076 = vmatpush3.bf16.msra.mxu0 %v1151_v15  ;;  %v298_v48 = vpack.c.bf16 %v287_v46, %v286_v45  ;;  %v289_v50 = vld [vmem:[%s1269_s25 + $0x58] sm:$0xff]  ;;  %v290_v51 = vld [vmem:[%s1269_s25 + $0x60] sm:$0xff]  ;;  %v291_v52 = vld [vmem:[%s1269_s25 + $0x68] sm:$0xff] }
  0x1a   : > { %1102 = vmatpush3.bf16.msra.mxu1 %v1156_v25  ;;  %v299_v53 = vpack.c.bf16 %v289_v50, %v288_v49  ;;  %v300_v54 = vpack.c.bf16 %v291_v52, %v290_v51  ;;  %v292_v55 = vld [vmem:[%s1269_s25 + $0x70] sm:$0xff]  ;;  %v293_v56 = vld [vmem:[%s1269_s25 + $0x78] sm:$0xff] }
  0x1b   : > { %1103 = vmatprep.subr.bf16.mxu1 %v1157_v26  ;;  %v301_v57 = vpack.c.bf16 %v293_v56, %v292_v55 }
  0x1c   : > { %1062 = vmatmul.mubr.msk.bf16.gmra.mrb[4].mxu0 %vm331_vm1, %v325_v21 }
  0x1d   : > { %1065 = vmatprep.mubr.msk.bf16.mxu0 %vm331_vm1, %v326_v22 }
  0x1e   : > { %1104 = vmatpush3.bf16.msra.mxu1 %v1157_v26 }
  0x1f   : > { %1105 = vmatprep.subr.bf16.mxu1 %v1158_v58 }
  0x22   : > { %1106 = vmatpush3.bf16.msra.mxu1 %v1158_v58 }
  0x23   : > { %1107 = vmatprep.subr.bf16.mxu1 %v1159_v59 }
  0x24   : > { %1066 = vmatmul.mubr.msk.bf16.gmra.mrb[8].mxu0 %vm331_vm1, %v327_v29 }
  0x25   : > { %1069 = vmatprep.mubr.msk.bf16.mxu0 %vm331_vm1, %v328_v30 }
  0x26   : > { %1108 = vmatpush3.bf16.msra.mxu1 %v1159_v59  ;;  %v1319_v59 = vld [vmem:[%s1400_s5 + $0x2] ss:$0 sm:$0xff] }
  0x2c   : > { %1070 = vmatmul.mubr.msk.bf16.gmra.mrb[12].mxu0 %vm331_vm1, %v329_v35 }
  0x2d   : > { %1077 = vmatprep.mubr.msk.bf16.mxu0 %vm469_vm2, %v294_v36 }
  0x34   : > { %1078 = vmatmul.mubr.msk.bf16.vlgmr.msra.gmra.mrb[0].mxu0 %vm469_vm2, %v295_v41 }
  0x35   : > { %1081 = vmatprep.mubr.msk.bf16.mxu0 %vm469_vm2, %v296_v42 }
  0x3c   : > { %1082 = vmatmul.mubr.msk.bf16.gmra.mrb[4].mxu0 %vm469_vm2, %v297_v47 }
  0x3d   : > { %1085 = vmatprep.mubr.msk.bf16.mxu0 %vm469_vm2, %v298_v48 }
  0x44   : > { %1086 = vmatmul.mubr.msk.bf16.gmra.mrb[8].mxu0 %vm469_vm2, %v299_v53  ;;  %v1312_v53 = vld [vmem:[%s1400_s5 + $0x1] ss:$0 sm:$0xff] }
  0x45   : > { %1089 = vmatprep.mubr.msk.bf16.mxu0 %vm469_vm2, %v300_v54 }
  0x4c   : > { %1090 = vmatmul.mubr.msk.bf16.gmra.mrb[12].mxu0 %vm469_vm2, %v301_v57 }
 0x107   : > { %v1079_v61 = vpop.f32.mrb[0].mxu0 }
 0x108   : > { %v598_v62 = vadd.f32 %v1079_v61, %v1006_v60  ;;  %v528_v63 = vpop.f32.mrb[1].mxu0 }
 0x109   : > { %v596_v0 = vadd.f32 %v1006_v60, %v528_v63  ;;  %v1080_v1 = vpop.f32.mrb[2].mxu0 }
 0x10a   : > { %v599_v2 = vadd.f32 %v1080_v1, %v1006_v60  ;;  %v531_v3 = vpop.f32.mrb[3].mxu0  ;;  %v614_v5 = vmax.f32 %v598_v62, 0.0 }
 0x10b   : > { %v597_v4 = vadd.f32 %v1006_v60, %v531_v3  ;;  %v612_v7 = vmax.f32 %v596_v0, 0.0 }
 0x10c   : > { %v615_v6 = vmax.f32 %v599_v2, 0.0 }
 0x10d   : > { %v613_v8 = vmax.f32 %v597_v4, 0.0 }
 0x10e   : > { %v629_v9 = vpack.c.bf16 %v615_v6, %v614_v5 }
 0x10f   : > { %v1083_v10 = vpop.f32.mrb[4].mxu0  ;;  %v628_v11 = vpack.c.bf16 %v613_v8, %v612_v7 }
 0x110   : > { %v602_v12 = vadd.f32 %v1083_v10, %v1006_v60  ;;  %v544_v13 = vpop.f32.mrb[5].mxu0 }
 0x111   : > { %v600_v14 = vadd.f32 %v1006_v60, %v544_v13  ;;  %v1084_v15 = vpop.f32.mrb[6].mxu0  ;;  %1109 = vmatprep.mubr.bf16.mxu1 %v628_v11 }
 0x112   : > { %v603_v16 = vadd.f32 %v1084_v15, %v1006_v60  ;;  %v547_v17 = vpop.f32.mrb[7].mxu0  ;;  %1110 = vmatmul.mubr.bf16.vlgmr.msra.gmra.mrb[0].mxu1 %v629_v9  ;;  %v618_v19 = vmax.f32 %v602_v12, 0.0 }
 0x113   : > { %v601_v18 = vadd.f32 %v1006_v60, %v547_v17  ;;  %v616_v21 = vmax.f32 %v600_v14, 0.0 }
 0x114   : > { %v619_v20 = vmax.f32 %v603_v16, 0.0 }
 0x115   : > { %v617_v22 = vmax.f32 %v601_v18, 0.0 }
 0x116   : > { %v631_v23 = vpack.c.bf16 %v619_v20, %v618_v19 }
 0x117   : > { %v630_v24 = vpack.c.bf16 %v617_v22, %v616_v21  ;;  %v1087_v25 = vpop.f32.mrb[8].mxu0 }
 0x118   : > { %v606_v26 = vadd.f32 %v1087_v25, %v1006_v60  ;;  %v560_v27 = vpop.f32.mrb[9].mxu0 }
 0x119   : > { %v604_v28 = vadd.f32 %v1006_v60, %v560_v27  ;;  %v1088_v29 = vpop.f32.mrb[10].mxu0  ;;  %1113 = vmatprep.mubr.bf16.mxu1 %v630_v24 }
 0x11a   : > { %v607_v30 = vadd.f32 %v1088_v29, %v1006_v60  ;;  %v563_v31 = vpop.f32.mrb[11].mxu0  ;;  %1114 = vmatmul.mubr.bf16.gmra.mrb[4].mxu1 %v631_v23  ;;  %v622_v33 = vmax.f32 %v606_v26, 0.0 }
 0x11b   : > { %v605_v32 = vadd.f32 %v1006_v60, %v563_v31  ;;  %v620_v35 = vmax.f32 %v604_v28, 0.0 }
 0x11c   : > { %v623_v34 = vmax.f32 %v607_v30, 0.0 }
 0x11d   : > { %v621_v36 = vmax.f32 %v605_v32, 0.0 }
 0x11e   : > { %v633_v37 = vpack.c.bf16 %v623_v34, %v622_v33 }
 0x11f   : > { %v632_v38 = vpack.c.bf16 %v621_v36, %v620_v35  ;;  %v1091_v39 = vpop.f32.mrb[12].mxu0 }
 0x120   : > { %v610_v40 = vadd.f32 %v1091_v39, %v1006_v60  ;;  %v576_v41 = vpop.f32.mrb[13].mxu0 }
 0x121   : > { %v608_v42 = vadd.f32 %v1006_v60, %v576_v41  ;;  %v1092_v43 = vpop.f32.mrb[14].mxu0  ;;  %1117 = vmatprep.mubr.bf16.mxu1 %v632_v38 }
 0x122   : > { %v611_v44 = vadd.f32 %v1092_v43, %v1006_v60  ;;  %v579_v45 = vpop.f32.mrb[15].mxu0  ;;  %1118 = vmatmul.mubr.bf16.gmra.mrb[8].mxu1 %v633_v37  ;;  %v626_v47 = vmax.f32 %v610_v40, 0.0 }
 0x123   : > { %v609_v46 = vadd.f32 %v1006_v60, %v579_v45  ;;  %v624_v49 = vmax.f32 %v608_v42, 0.0 }
 0x124   : > { %v627_v48 = vmax.f32 %v611_v44, 0.0 }
 0x125   : > { %v625_v50 = vmax.f32 %v609_v46, 0.0 }
 0x126   : > { %v635_v51 = vpack.c.bf16 %v627_v48, %v626_v47 }
 0x127   : > { %v634_v52 = vpack.c.bf16 %v625_v50, %v624_v49 }
 0x129   : > { %1121 = vmatprep.mubr.bf16.mxu1 %v634_v52 }
 0x12a   : > { %1122 = vmatmul.mubr.bf16.gmra.mrb[12].mxu1 %v635_v51 }
 0x1e5   : > { %v1111_v54 = vpop.f32.mrb[0].mxu1 }
 0x1e6   : > { %v748_v55 = vadd.f32 %v1111_v54, %v1312_v53  ;;  %v739_v56 = vpop.f32.mrb[1].mxu1 }
 0x1e7   : > { %v740_v57 = vadd.f32 %v1312_v53, %v739_v56  ;;  %v1112_v58 = vpop.f32.mrb[2].mxu1 }
 0x1e8   : > { %v804_v60 = vmax.f32 %v748_v55, 0.0  ;;  %v751_v61 = vadd.f32 %v1112_v58, %v1312_v53  ;;  %v742_v62 = vpop.f32.mrb[3].mxu1 }
 0x1e9   : > { %v802_v63 = vmax.f32 %v740_v57, 0.0  ;;  %v743_v0 = vadd.f32 %v1312_v53, %v742_v62 }
 0x1ea   : > { %v805_v1 = vmax.f32 %v751_v61, 0.0  ;;  %v826_v2 = vmul.f32 %v1319_v59, %v804_v60 }
 0x1eb   : > { %v803_v3 = vmax.f32 %v743_v0, 0.0  ;;  %v824_v4 = vmul.f32 %v1319_v59, %v802_v63 }
 0x1ec   : > { %844 = vadd.xlane.f32.xlu1 %v826_v2  ;;  %v827_v8 = vmul.f32 %v1319_v59, %v805_v1 }
 0x1ed   : > { %840 = vadd.xlane.f32.xlu0 %v824_v4  ;;  %v1115_v5 = vpop.f32.mrb[4].mxu1  ;;  %v825_v11 = vmul.f32 %v1319_v59, %v803_v3 }
 0x1ee   : > { %v764_v6 = vadd.f32 %v1115_v5, %v1312_v53  ;;  %v755_v7 = vpop.f32.mrb[5].mxu1 }
 0x1ef   : > { %v756_v9 = vadd.f32 %v1312_v53, %v755_v7  ;;  %v1116_v10 = vpop.f32.mrb[6].mxu1 }
 0x1f0   : > { %v808_v12 = vmax.f32 %v764_v6, 0.0  ;;  %v767_v13 = vadd.f32 %v1116_v10, %v1312_v53  ;;  %846 = vadd.xlane.f32.xlu1 %v827_v8  ;;  %v758_v14 = vpop.f32.mrb[7].mxu1 }
 0x1f1   : > { %v759_v15 = vadd.f32 %v1312_v53, %v758_v14  ;;  %842 = vadd.xlane.f32.xlu0 %v825_v11  ;;  %v806_v18 = vmax.f32 %v756_v9, 0.0 }
 0x1f2   : > { %v809_v16 = vmax.f32 %v767_v13, 0.0  ;;  %v830_v17 = vmul.f32 %v1319_v59, %v808_v12 }
 0x1f3   : > { %v807_v19 = vmax.f32 %v759_v15, 0.0  ;;  %v828_v26 = vmul.f32 %v1319_v59, %v806_v18 }
 0x1f4   : > { %v831_v20 = vmul.f32 %v1319_v59, %v809_v16 }
 0x1f5   : > { %852 = vadd.xlane.f32.xlu0 %v830_v17  ;;  %v1119_v21 = vpop.f32.mrb[8].mxu1  ;;  %v829_v30 = vmul.f32 %v1319_v59, %v807_v19 }
 0x1f6   : > { %v780_v22 = vadd.f32 %v1119_v21, %v1312_v53  ;;  %854 = vadd.xlane.f32.xlu1 %v831_v20  ;;  %v771_v23 = vpop.f32.mrb[9].mxu1 }
 0x1f7   : > { %v772_v24 = vadd.f32 %v1312_v53, %v771_v23  ;;  %v1120_v25 = vpop.f32.mrb[10].mxu1 }
 0x1f8   : > { %v812_v27 = vmax.f32 %v780_v22, 0.0  ;;  %v783_v28 = vadd.f32 %v1120_v25, %v1312_v53  ;;  %v774_v29 = vpop.f32.mrb[11].mxu1 }
 0x1f9   : > { %v775_v31 = vadd.f32 %v1312_v53, %v774_v29  ;;  %848 = vadd.xlane.f32.xlu0 %v828_v26  ;;  %v810_v34 = vmax.f32 %v772_v24, 0.0 }
 0x1fa   : > { %v813_v32 = vmax.f32 %v783_v28, 0.0  ;;  %850 = vadd.xlane.f32.xlu1 %v829_v30  ;;  %v834_v33 = vmul.f32 %v1319_v59, %v812_v27 }
 0x1fb   : > { %v811_v35 = vmax.f32 %v775_v31, 0.0  ;;  %v832_v42 = vmul.f32 %v1319_v59, %v810_v34 }
 0x1fc   : > { %v835_v36 = vmul.f32 %v1319_v59, %v813_v32 }
 0x1fd   : > { %860 = vadd.xlane.f32.xlu0 %v834_v33  ;;  %v1123_v37 = vpop.f32.mrb[12].mxu1  ;;  %v833_v44 = vmul.f32 %v1319_v59, %v811_v35 }
 0x1fe   : > { %862 = vadd.xlane.f32.xlu1 %v835_v36  ;;  %v787_v38 = vpop.f32.mrb[13].mxu1  ;;  %v796_v39 = vadd.f32 %v1123_v37, %v1312_v53 }
 0x1ff   : > { %v788_v40 = vadd.f32 %v1312_v53, %v787_v38  ;;  %v1124_v41 = vpop.f32.mrb[14].mxu1 }
 0x200   : > { %v790_v43 = vpop.f32.mrb[15].mxu1  ;;  %v799_v46 = vadd.f32 %v1124_v41, %v1312_v53  ;;  %v816_v48 = vmax.f32 %v796_v39, 0.0 }
 0x201   : > { %v814_v45 = vmax.f32 %v788_v40, 0.0  ;;  %v791_v47 = vadd.f32 %v1312_v53, %v790_v43  ;;  %856 = vadd.xlane.f32.xlu0 %v832_v42  ;;  %v1017_v53 = vld [vmem:[%s1400_s5 + $0x3] ss:$0 sm:$0xff] }
 0x202   : > { %858 = vadd.xlane.f32.xlu1 %v833_v44  ;;  %v817_v51 = vmax.f32 %v799_v46, 0.0  ;;  %v838_v54 = vmul.f32 %v1319_v59, %v816_v48 }
 0x203   : > { %v815_v49 = vmax.f32 %v791_v47, 0.0  ;;  %v836_v50 = vmul.f32 %v1319_v59, %v814_v45 }
 0x204   : > { %v839_v55 = vmul.f32 %v1319_v59, %v817_v51 }
 0x205   : > { %864 = vadd.xlane.f32.xlu0 %v836_v50  ;;  %v837_v52 = vmul.f32 %v1319_v59, %v815_v49 }
 0x207   : > { %866 = vadd.xlane.f32.xlu1 %v837_v52 }
 0x209   : > { %868 = vadd.xlane.f32.xlu0 %v838_v54 }
 0x20b   : > { %870 = vadd.xlane.f32.xlu1 %v839_v55 }
 0x279   : > { %v845_v56 = vpop.xlane.xlu1 %844 }
 0x27a   : > { %v878_v57 = vadd.f32 %v1017_v53, %v845_v56  ;;  %v841_v58 = vpop.xlane.xlu0 %840 }
 0x27b   : > { %v876_v59 = vadd.f32 %v1017_v53, %v841_v58 }
 0x27c   : > { %895 = vst.msk [vmem:[%s1358_s17 + $0x10] sm:$0xff] %vm892_vm3, %v878_v57 }
 0x27d   : > { %893 = vst.msk [vmem:[%s1358_s17] sm:$0xff] %vm892_vm3, %v876_v59  ;;  %v847_v60 = vpop.xlane.xlu1 %846 }
 0x27e   : > { %v879_v61 = vadd.f32 %v1017_v53, %v847_v60  ;;  %v843_v62 = vpop.xlane.xlu0 %842 }
 0x27f   : > { %v877_v63 = vadd.f32 %v1017_v53, %v843_v62 }
 0x280   : > { %896 = vst.msk [vmem:[%s1358_s17 + $0x18] sm:$0xff] %vm892_vm3, %v879_v61 }
 0x281   : > { %894 = vst.msk [vmem:[%s1358_s17 + $0x8] sm:$0xff] %vm892_vm3, %v877_v63 }
 0x282   : > { %v853_v0 = vpop.xlane.xlu0 %852 }
 0x283   : > { %v882_v1 = vadd.f32 %v1017_v53, %v853_v0  ;;  %v855_v2 = vpop.xlane.xlu1 %854 }
 0x284   : > { %v883_v3 = vadd.f32 %v1017_v53, %v855_v2 }
 0x285   : > { %899 = vst.msk [vmem:[%s1358_s17 + $0x30] sm:$0xff] %vm892_vm3, %v882_v1 }
 0x286   : > { %900 = vst.msk [vmem:[%s1358_s17 + $0x38] sm:$0xff] %vm892_vm3, %v883_v3  ;;  %v849_v4 = vpop.xlane.xlu0 %848 }
 0x287   : > { %v880_v5 = vadd.f32 %v1017_v53, %v849_v4  ;;  %v851_v6 = vpop.xlane.xlu1 %850 }
 0x288   : > { %v881_v7 = vadd.f32 %v1017_v53, %v851_v6 }
 0x289   : > { %897 = vst.msk [vmem:[%s1358_s17 + $0x20] sm:$0xff] %vm892_vm3, %v880_v5 }
 0x28a   : > { %898 = vst.msk [vmem:[%s1358_s17 + $0x28] sm:$0xff] %vm892_vm3, %v881_v7  ;;  %v861_v8 = vpop.xlane.xlu0 %860 }
 0x28b   : > { %v886_v9 = vadd.f32 %v1017_v53, %v861_v8  ;;  %v863_v10 = vpop.xlane.xlu1 %862 }
 0x28c   : > { %v887_v11 = vadd.f32 %v1017_v53, %v863_v10 }
 0x28d   : > { %903 = vst.msk [vmem:[%s1358_s17 + $0x50] sm:$0xff] %vm892_vm3, %v886_v9 }
 0x28e   : > { %904 = vst.msk [vmem:[%s1358_s17 + $0x58] sm:$0xff] %vm892_vm3, %v887_v11  ;;  %v857_v12 = vpop.xlane.xlu0 %856 }
 0x28f   : > { %v884_v13 = vadd.f32 %v1017_v53, %v857_v12  ;;  %v859_v14 = vpop.xlane.xlu1 %858 }
 0x290   : > { %v885_v15 = vadd.f32 %v1017_v53, %v859_v14 }
 0x291   : > { %901 = vst.msk [vmem:[%s1358_s17 + $0x40] sm:$0xff] %vm892_vm3, %v884_v13 }
 0x292   : > { %902 = vst.msk [vmem:[%s1358_s17 + $0x48] sm:$0xff] %vm892_vm3, %v885_v15  ;;  %v865_v16 = vpop.xlane.xlu0 %864 }
 0x293   : > { %v888_v17 = vadd.f32 %v1017_v53, %v865_v16 }
 0x294   : > { %v867_v18 = vpop.xlane.xlu1 %866 }
 0x295   : > { %905 = vst.msk [vmem:[%s1358_s17 + $0x60] sm:$0xff] %vm892_vm3, %v888_v17  ;;  %v889_v19 = vadd.f32 %v1017_v53, %v867_v18 }
 0x296   : > { %v869_v20 = vpop.xlane.xlu0 %868 }
 0x297   : > { %906 = vst.msk [vmem:[%s1358_s17 + $0x68] sm:$0xff] %vm892_vm3, %v889_v19  ;;  %v890_v21 = vadd.f32 %v1017_v53, %v869_v20 }
 0x298   : > { %v871_v22 = vpop.xlane.xlu1 %870 }
 0x299   : > { %907 = vst.msk [vmem:[%s1358_s17 + $0x70] sm:$0xff] %vm892_vm3, %v890_v21  ;;  %v891_v23 = vadd.f32 %v1017_v53, %v871_v22 }
 0x29b   : > { %908 = vst.msk [vmem:[%s1358_s17 + $0x78] sm:$0xff] %vm892_vm3, %v891_v23 }
 0x29c PF: > { %s16_s21 = sadd.s32 1, %s1166_s21  }
 0x29d   : > { %p13_p4 = scmp.ge.s32.totalorder %s16_s21, 4  }
 0x29f   :  { %15 = sbr.rel (!%p13_p4) target bundleno = 1 (0x1), region = 77 }

</bundles_post_ra>
